<compile_context>
chip_gen: v7x
topology: tpu7x:2x2x1
jax: 0.10.0
libtpu: 0.0.40
codegen_flags: <defaults>
</compile_context>

<pallas_src>
import jax
import jax.numpy as jnp
from jax.experimental import pallas as pl
from jax.experimental.pallas import tpu as pltpu


def _round_up(x, m):
    return (x + m - 1) // m * m


def _vmem_capacity_bytes():
    """Per-core VMEM capacity; conservative 64 MiB (v7x) fallback."""
    try:
        cap = getattr(pltpu.get_tpu_info(), "vmem_capacity_bytes", None)
        if cap:
            return int(cap)
    except Exception:
        pass
    return 64 * 1024 * 1024


def _linear_kernel(x_ref, w_ref, b_ref, o_ref):
    # x_ref: (tm, K) bf16, w_ref: (K, E) bf16, b_ref: (1, E) f32,
    # o_ref: (tm, E).  MXU matmul with f32 accumulation, bias added in f32,
    # final cast to the (bf16) output dtype.
    acc = jnp.dot(x_ref[...], w_ref[...], preferred_element_type=jnp.float32)
    o_ref[...] = (acc + b_ref[...]).astype(o_ref.dtype)


def _pick_tile_m(M, K, E, out_itemsize, tm_target, vmem_budget):
    """Largest M-tile <= tm_target whose double-buffered working set fits."""
    # VMEM layout pads the minor dim to 128 lanes; estimate with padded dims.
    Kl = _round_up(K, 128)
    El = _round_up(E, 128)
    tm = min(tm_target, _round_up(max(M, 8), 8))

    def bytes_needed(t):
        return (2 * t * Kl * 2                 # x tile (bf16), double-buffered
                + 2 * Kl * El * 2              # weights (bf16), conservative 2 bufs
                + 2 * t * El * out_itemsize    # output tile, double-buffered
                + 2 * 8 * El * 4)              # bias (padded to 8 sublanes)

    while tm > 8 and bytes_needed(tm) > vmem_budget:
        tm = _round_up(tm // 2, 8)
    return tm, bytes_needed(tm)


def patch_linear(x_patches, w, b, out_dtype=jnp.bfloat16, tm_target=None):
    """(M, K) @ (K, E) + b as an M-tiled, bf16-input Pallas matmul.

    No M/K padding: the grid is pl.cdiv(M, tm) with the unpadded out_shape so
    Pallas masks the ragged last block; the K block equals the full K.
    """
    M, K = x_patches.shape
    E = w.shape[1]

    cap = _vmem_capacity_bytes()
    # Generation-aware budgets: keep headroom on v7x (64 MiB/TC), take bigger
    # tiles (longer DMA bursts, fewer grid steps) on v5e/v6e (128 MiB).
    tile_budget = min(48 * 1024 * 1024, int(0.55 * cap))
    if tm_target is None:
        tm_target = 1024 if cap <= 72 * 1024 * 1024 else 2048

    out_itemsize = jnp.dtype(out_dtype).itemsize
    tm, vmem_need = _pick_tile_m(M, K, E, out_itemsize, tm_target, tile_budget)
    grid_m = pl.cdiv(M, tm)

    xb = x_patches.astype(jnp.bfloat16)
    wb = w.astype(jnp.bfloat16)
    b2 = b.astype(jnp.float32).reshape(1, E)

    # Limit >= actual working set, capped generation-aware (~0.7 * capacity,
    # never above 64 MiB) so Mosaic internal scratch always has headroom.
    vmem_limit = int(min(max(2 * vmem_need, 16 * 1024 * 1024),
                         int(0.70 * cap), 64 * 1024 * 1024))

    return pl.pallas_call(
        _linear_kernel,
        out_shape=jax.ShapeDtypeStruct((M, E), out_dtype),
        grid=(grid_m,),
        in_specs=[
            pl.BlockSpec((tm, K), lambda i: (i, 0)),   # x: tiled over M, full K
            pl.BlockSpec((K, E), lambda i: (0, 0)),    # weights: VMEM-resident
            pl.BlockSpec((1, E), lambda i: (0, 0)),    # bias: VMEM-resident
        ],
        out_specs=pl.BlockSpec((tm, E), lambda i: (i, 0)),
        compiler_params=pltpu.CompilerParams(
            dimension_semantics=("parallel",),
            vmem_limit_bytes=vmem_limit,
            # Let XLA fuse the bf16 cast + patch rearrange into the x operand
            # so the (M, K) intermediate need not be materialized in HBM.
            allow_input_fusion=[True, False, False],
        ),
    )(xb, wb, b2)


def patch_embedding(x, w, b, patch_size, out_dtype=jnp.bfloat16):
    """PatchEmbedding.forward.

    x: (B, C, H, W) -> (B, (H//p)*(W//p), emb_size)
    w: (p*p*C, emb_size) with rows in the module's '(p1 p2 c)' order,
    b: (emb_size,)
    """
    B, C, H, W = x.shape
    p = patch_size
    h, wg = H // p, W // p

    # Rearrange in '(c p1 p2)' order: the innermost output axis (p2) has
    # stride 1 in the source, so this copies p-length contiguous runs (HBM
    # streaming speed) instead of the per-element gather that '(p1 p2 c)'
    # would require.  The bf16 cast rides in the same fused producer.
    xr = x.astype(jnp.bfloat16).reshape(B, C, h, p, wg, p)     # b c h p1 w p2
    xr = jnp.transpose(xr, (0, 2, 4, 1, 3, 5))                 # b h w c p1 p2
    flat = xr.reshape(B * h * wg, C * p * p)                   # (M, K)

    # Permute the Linear weight rows '(p1 p2 c)' -> '(c p1 p2)' once (tiny),
    # so flat @ w_cpp == x_ppc @ w exactly (same reduction, reordered terms).
    w_cpp = jnp.transpose(w.reshape(p, p, C, -1), (2, 0, 1, 3))
    w_cpp = w_cpp.reshape(C * p * p, -1)

    out = patch_linear(flat, w_cpp, b, out_dtype=out_dtype)    # (M, E)
    return out.reshape(B, h * wg, -1)


if __name__ == "__main__":
    # Small shapes consistent with the module.
    batch, in_channels, spatial = 2, 4, 16
    patch_size, emb_size = 8, 128
    patch_dim = patch_size * patch_size * in_channels  # 256

    key = jax.random.PRNGKey(0)
    kx, kw, kb = jax.random.split(key, 3)
    x = jax.random.normal(kx, (batch, in_channels, spatial, spatial),
                          dtype=jnp.float32)
    # nn.Linear(patch_dim, emb_size) params stored as (in, out) so the kernel
    # computes x @ W + b.
    bound = 1.0 / (patch_dim ** 0.5)
    w = jax.random.uniform(kw, (patch_dim, emb_size), jnp.float32,
                           minval=-bound, maxval=bound)
    b = jax.random.uniform(kb, (emb_size,), jnp.float32,
                           minval=-bound, maxval=bound)

    # jit the whole forward so the rearrange producer can fuse into the
    # pallas_call (allow_input_fusion) instead of materializing in HBM.
    fwd = jax.jit(patch_embedding, static_argnames=("patch_size", "out_dtype"))
    out = jax.block_until_ready(fwd(x, w, b, patch_size=patch_size))

    n_patches = (spatial // patch_size) ** 2
    assert out.shape == (batch, n_patches, emb_size), out.shape
    assert out.dtype == jnp.bfloat16, out.dtype

    # Reference: plain-JAX f32 forward with the module's '(p1 p2 c)' layout
    # and the original (unpermuted) weight.  Tolerance loosened for bf16 MXU
    # inputs / bf16 output (accumulation + bias-add are f32 in the kernel).
    xr = x.reshape(batch, in_channels, 2, patch_size, 2, patch_size)
    xr = jnp.transpose(xr, (0, 2, 4, 3, 5, 1)).reshape(batch, n_patches,
                                                       patch_dim)
    ref = xr @ w + b
    out_f32 = out.astype(jnp.float32)
    assert jnp.allclose(out_f32, ref, atol=5e-2, rtol=5e-2), (
        float(jnp.max(jnp.abs(out_f32 - ref))))

    print("KERNEL_OK")
</pallas_src>

<mosaic_0001>
module attributes {stable_mosaic.version = 11 : i64} {
  func.func @_linear_kernel(%arg0: i32, %arg1: memref<8x256xbf16, #tpu.memory_space<vmem>>, %arg2: memref<256x128xbf16, #tpu.memory_space<vmem>>, %arg3: memref<1x128xf32, #tpu.memory_space<vmem>>, %arg4: memref<8x128xbf16, #tpu.memory_space<vmem>>) attributes {dimension_semantics = [#tpu.dimension_semantics<parallel>], iteration_bounds = array<i64: 1>, scalar_prefetch = 0 : i64, scratch_operands = 0 : i64, tpu.core_type = #tpu.core_type<tc>, window_params = [{transform_indices = @transform_0, window_bounds = array<i64: 8, 256>}, {pipeline_mode = #tpu.pipeline_mode<synchronous>, transform_indices = @transform_1, window_bounds = array<i64: 256, 128>}, {pipeline_mode = #tpu.pipeline_mode<synchronous>, transform_indices = @transform_2, window_bounds = array<i64: 1, 128>}, {transform_indices = @transform_3, window_bounds = array<i64: 8, 128>}]} {
    %c0 = arith.constant 0 : index
    %c0_0 = arith.constant 0 : index
    %0 = vector.load %arg1[%c0, %c0_0] : memref<8x256xbf16, #tpu.memory_space<vmem>>, vector<8x256xbf16>
    %c0_1 = arith.constant 0 : index
    %c0_2 = arith.constant 0 : index
    %1 = vector.load %arg2[%c0_1, %c0_2] : memref<256x128xbf16, #tpu.memory_space<vmem>>, vector<256x128xbf16>
    %cst = arith.constant dense<0.000000e+00> : vector<8x128xf32>
    %2 = tpu.matmul %0, %1, %cst {dimension_numbers = #tpu.dot_dimension_numbers<[1], [0], [0], [1], [0, 0, 1, 1], [], []>} : vector<8x256xbf16>, vector<256x128xbf16>, vector<8x128xf32> -> vector<8x128xf32>
    %c0_3 = arith.constant 0 : index
    %c0_4 = arith.constant 0 : index
    %3 = vector.load %arg3[%c0_3, %c0_4] : memref<1x128xf32, #tpu.memory_space<vmem>>, vector<1x128xf32>
    %4 = vector.broadcast %3 : vector<1x128xf32> to vector<8x128xf32>
    %5 = arith.addf %2, %4 : vector<8x128xf32>
    %6 = arith.truncf %5 : vector<8x128xf32> to vector<8x128xbf16>
    %c0_5 = arith.constant 0 : index
    %c0_6 = arith.constant 0 : index
    %7 = vector.load %arg4[%c0_5, %c0_6] : memref<8x128xbf16, #tpu.memory_space<vmem>>, vector<8x128xbf16>
    tpu.vector_store %arg4[%c0_5, %c0_6], %6 {strides = array<i32>} : memref<8x128xbf16, #tpu.memory_space<vmem>>, vector<8x128xbf16>,
    return
  }
  func.func @transform_0(%arg0: i32) -> (i32, i32) {
    %c0_i32 = arith.constant 0 : i32
    %c0_i32_0 = arith.constant 0 : i32
    return %arg0, %c0_i32 : i32, i32
  }
  func.func @transform_1(%arg0: i32) -> (i32, i32) {
    %c0_i32 = arith.constant 0 : i32
    %c0_i32_0 = arith.constant 0 : i32
    %c0_i32_1 = arith.constant 0 : i32
    return %c0_i32, %c0_i32_0 : i32, i32
  }
  func.func @transform_2(%arg0: i32) -> (i32, i32) {
    %c0_i32 = arith.constant 0 : i32
    %c0_i32_0 = arith.constant 0 : i32
    %c0_i32_1 = arith.constant 0 : i32
    return %c0_i32, %c0_i32_0 : i32, i32
  }
  func.func @transform_3(%arg0: i32) -> (i32, i32) {
    %c0_i32 = arith.constant 0 : i32
    %c0_i32_0 = arith.constant 0 : i32
    return %arg0, %c0_i32 : i32, i32
  }
}

</mosaic_0001>

<bundles_post_ra>
// kernel: patch_embedding.1
= control target key start
LH: loop header
LB: loop body
LE: loop exit
PB: predicated region body
PF: predicated region fallthrough
CT: control target
= control target key end

     0   :  { %s386_s0 = inlined_call_operand.vmem [shape: bf16[8,256], index: 0, kind: input, shape index: {}]   ;;  %s387_s1 = inlined_call_operand.vmem [shape: bf16[256,128], index: 1, kind: input, shape index: {}]   ;;  %s388_s2 = inlined_call_operand.vmem [shape: f32[1,128], index: 2, kind: input, shape index: {}]   ;;  %s389_s3 = inlined_call_operand.hbm [shape: bf16[8,128], index: 3, kind: output, shape index: {}]  }
   0x1   :  { %v257_v0 = vld [vmem:[%s387_s1 + $0x40] sm:$0xff]   ;;  %v259_v2 = vld [vmem:[%s387_s1 + $0x48] sm:$0xff]   ;;  %v261_v4 = vld [vmem:[%s387_s1 + $0x50] sm:$0xff]  }
   0x2   :  { %v258_v1 = vld [vmem:[%s387_s1] sm:$0xff]   ;;  %234 = vmatprep.subr.bf16.mxu0 %v257_v0  ;;  %v260_v3 = vld [vmem:[%s387_s1 + $0x8] sm:$0xff]   ;;  %v262_v5 = vld [vmem:[%s387_s1 + $0x10] sm:$0xff]  }
   0x3   :  { %235 = vmatpush3.bf16.msra.mxu0 %v258_v1  ;;  %v263_v6 = vld [vmem:[%s387_s1 + $0x58] sm:$0xff]   ;;  %v265_v8 = vld [vmem:[%s387_s1 + $0x60] sm:$0xff]   ;;  %v267_v10 = vld [vmem:[%s387_s1 + $0x68] sm:$0xff]  }
   0x4   :  { %236 = vmatprep.subr.bf16.mxu0 %v259_v2  ;;  %v264_v7 = vld [vmem:[%s387_s1 + $0x18] sm:$0xff]   ;;  %v266_v9 = vld [vmem:[%s387_s1 + $0x20] sm:$0xff]  }
   0x5   :  { %v16_v11 = vld [vmem:[%s386_s0] sm:$0xff] }
   0x7   :  { %237 = vmatpush3.bf16.msra.mxu0 %v260_v3 }
   0x8   :  { %238 = vmatprep.subr.bf16.mxu0 %v261_v4 }
   0xb   :  { %239 = vmatpush3.bf16.msra.mxu0 %v262_v5 }
   0xc   :  { %240 = vmatprep.subr.bf16.mxu0 %v263_v6 }
   0xf   :  { %241 = vmatpush3.bf16.msra.mxu0 %v264_v7 }
  0x10   :  { %242 = vmatprep.subr.bf16.mxu0 %v265_v8 }
  0x11   :  { %8 = vsyncpa [#allocation3], 0  ;;  %v217_v12 = vcombine.high %v16_v11, %v16_v11  ;;  %v268_v13 = vld [vmem:[%s387_s1 + $0x28] sm:$0xff]   ;;  %v269_v14 = vld [vmem:[%s387_s1 + $0x70] sm:$0xff]   ;;  %v216_v18 = vcombine.low %v16_v11, %v16_v11  ;;  %s299_s20 = smov [#allocation2]  }
  0x12   :  { %v270_v15 = vld [vmem:[%s387_s1 + $0x30] sm:$0xff]   ;;  %v271_v16 = vld [vmem:[%s387_s1 + $0x78] sm:$0xff]   ;;  %v215_v20 = vld [vmem:[%s388_s2] ss:$0 sm:$0xff]  ;;  %s207_s21 = sshll.u32 %s299_s20, 4  ;;  %s208_s21 = int_to_ptr.vmem [resolvable:$true] %s207_s21 }
  0x13   :  { %243 = vmatpush3.bf16.msra.mxu0 %v266_v9  ;;  %191 = vmatprep.mubr.bf16.mxu0 %v217_v12  ;;  %v272_v17 = vld [vmem:[%s387_s1 + $0x38] sm:$0xff]   ;;  %s275_s1 = scalar_lea.vmem %s208_s21, 64  ;;  %p280_p1 = scmp.lt.s32.totalorder %s208_s21, %s208_s21 }
  0x14   :  { %244 = vmatprep.subr.bf16.mxu0 %v267_v10  ;;  %p276_p0 = scmp.ne.s32.totalorder %s208_s21, %s275_s1  ;;  %p281_p2 = scmp.lt.s32.totalorder %s275_s1, %s275_s1 }
  0x16   :  { %p282_p3 = por %p281_p2, %p280_p1 }
  0x17   :  { %245 = vmatpush3.bf16.msra.mxu0 %v268_v13 }
  0x18   :  { %246 = vmatprep.subr.bf16.mxu0 %v269_v14  ;;  %p283_p4 = pnand %p282_p3, %p276_p0 }
  0x1b   :  { %247 = vmatpush3.bf16.msra.mxu0 %v270_v15 }
  0x1c   :  { %248 = vmatprep.subr.bf16.mxu0 %v271_v16 }
  0x1f   :  { %249 = vmatpush3.bf16.msra.mxu0 %v272_v17 }
  0x22   :  { %192 = vmatmul.mubr.bf16.vlgmr.msra.gmra.mrb[0].mxu0 %v216_v18 }
  0xf5   :  { %v250_v19 = vpop.f32.mrb[0].mxu0 }
  0xf6   :  { %v251_v21 = vpop.f32.mrb[1].mxu0 }
  0xf7   :  { %v252_v22 = vadd.f32 %v251_v21, %v250_v19  ;;  %v253_v23 = vpop.f32.mrb[2].mxu0 }
  0xf8   :  { %v254_v24 = vpop.f32.mrb[3].mxu0 }
  0xf9   :  { %v194_v25 = vadd.f32 %v252_v22, %v215_v20 }
  0xfb   :  { %v199_v26 = vpack.c.bf16 %v194_v25, %v194_v25 }
  0xfd   :  { %200 = vst [vmem:[#allocation2] sm:$0xf] %v199_v26 }
  0xfe   :  { %286 = shalt.err (!%p283_p4)
}
  0xff   :  { %s287_s2 = scalar_lea.hbm %s389_s3, 64 }
 0x100   :  { %p288_p5 = scmp.ne.s32.totalorder %s389_s3, %s287_s2  ;;  %p291_p6 = scmp.lt.u32.totalorder %s287_s2, %s389_s3 }
 0x102   :  { %p293_p7 = pnand %p291_p6, %p288_p5 }
 0x104   :  { %296 = shalt.err (!%p293_p7)
}
 0x105   :  { %210 = dma.vmem_to_hbm [thread:$0]  %s208_s21, 64, %s389_s3, [#allocation3]  }
 0x106   :  { %297 = dma.done.wait [#allocation3], 64  }
 0x107   :  { %298 = vsyncadd [#allocation3], 4294967232 }
 0x108   :  { %214 = vsyncpa [#allocation3], 1 }

</bundles_post_ra>
